<compile_context>
chip_gen: v7x
topology: tpu7x:2x2x1
jax: 0.10.0
libtpu: 0.0.40
codegen_flags: <defaults>
</compile_context>

<pallas_src>
import functools

import jax
import jax.numpy as jnp
from jax.experimental import pallas as pl
from jax.experimental.pallas import tpu as pltpu


# --------------------------------------------------------------------------- #
# In-kernel helpers (traced, static shapes)
# --------------------------------------------------------------------------- #
def _fold_channel_groups(hsum, c, w_dim):
    """Sum w_dim contiguous channel groups (each of width c) along the lane axis.

    log2 halving folds for the even part (lane-aligned halves), linear fold for
    any odd remainder. w_dim == 1 is a no-op.
    """
    cur = hsum
    rem = w_dim
    while rem > 1 and rem % 2 == 0:
        half = cur.shape[-1] // 2
        cur = cur[:, :half] + cur[:, half:]
        rem //= 2
    out = cur[:, :c]
    for w in range(1, rem):
        out = out + cur[:, w * c:(w + 1) * c]
    return out


def _tile_channel_groups(s, w_dim):
    """Tile (Bt, C) -> (Bt, w_dim*C) by log2 doubling (+ one linear build for an
    odd factor). w_dim == 1 is a no-op."""
    odd, m = w_dim, 0
    while odd % 2 == 0:
        odd //= 2
        m += 1
    g = s
    if odd > 1:
        g = jnp.concatenate([g] * odd, axis=-1)
    for _ in range(m):
        g = jnp.concatenate([g, g], axis=-1)
    return g


def _mlp_gate(y, w1_ref, b1_ref, w2_ref, b2_ref):
    """Tiny squeeze/excite MLP in f32: sigmoid(relu(y@W1+b1)@W2+b2)."""
    hid = jnp.dot(y, w1_ref[...], preferred_element_type=jnp.float32) + b1_ref[...]
    hid = jnp.maximum(hid, 0.0)
    s = jnp.dot(hid, w2_ref[...], preferred_element_type=jnp.float32) + b2_ref[...]
    return jax.nn.sigmoid(s)


# --------------------------------------------------------------------------- #
# Kernels
# --------------------------------------------------------------------------- #
def _fused_kernel(x_ref, w1_ref, b1_ref, w2_ref, b2_ref, o_ref):
    """Single-pass kernel: whole image(s) resident per grid step."""
    bt, hd, wc = x_ref.shape
    c = w2_ref.shape[1]
    w_dim = wc // c

    # Spatial sum: sublane reduce with f32 accumulation (no block-sized f32 copy),
    # consumed immediately so x is not held live across the MLP.
    hsum = jnp.sum(x_ref[...], axis=1, dtype=jnp.float32)                 # (bt, wc)
    y = _fold_channel_groups(hsum, c, w_dim) * (1.0 / float(hd * w_dim))  # (bt, c)

    s = _mlp_gate(y, w1_ref, b1_ref, w2_ref, b2_ref)                      # (bt, c) f32

    # Build the lane-wide gate by log2 doubling, cast once at width C, then
    # re-read the already-resident input block for the multiply.
    gate = _tile_channel_groups(s.astype(o_ref.dtype), w_dim)             # (bt, wc)
    o_ref[...] = (x_ref[...] * gate[:, None, :]).astype(o_ref.dtype)


def _gate_pass_kernel(x_ref, w1_ref, b1_ref, w2_ref, b2_ref, g_ref, acc_ref, *, inv_n):
    """Two-phase pass 1: H-tiled spatial reduce + tiny MLP -> (B, C) gate."""
    h = pl.program_id(1)

    @pl.when(h == 0)
    def _():
        acc_ref[...] = jnp.zeros_like(acc_ref)

    acc_ref[...] += jnp.sum(x_ref[...], axis=1, dtype=jnp.float32)        # (1, wc)

    @pl.when(h == pl.num_programs(1) - 1)
    def _():
        c = w2_ref.shape[1]
        wc = acc_ref.shape[1]
        y = _fold_channel_groups(acc_ref[...], c, wc // c) * inv_n        # (1, c)
        g_ref[...] = _mlp_gate(y, w1_ref, b1_ref, w2_ref, b2_ref)


def _apply_pass_kernel(g_ref, x_ref, o_ref):
    """Two-phase pass 2: H-tiled elementwise gate multiply."""
    c = g_ref.shape[1]
    wc = x_ref.shape[2]
    gate = _tile_channel_groups(g_ref[...].astype(o_ref.dtype), wc // c)  # (1, wc)
    o_ref[...] = (x_ref[...] * gate[:, None, :]).astype(o_ref.dtype)


# --------------------------------------------------------------------------- #
# Wrapper
# --------------------------------------------------------------------------- #
def _budgets():
    """Per-generation (block_byte_budget, vmem_limit_bytes)."""
    try:
        vmem = pltpu.get_tpu_info().vmem_capacity_bytes
    except Exception:
        vmem = 128 * 1024 * 1024
    if vmem >= 128 * 1024 * 1024:
        # v5e / v6e: 128 MiB physical VMEM -> bigger blocks, explicitly raised limit.
        return 4 * 1024 * 1024, 64 * 1024 * 1024
    # v7x-class: 64 MiB physical (32 MiB default scoped) -> conservative blocks.
    return 2 * 1024 * 1024, 32 * 1024 * 1024


def _pick_bt(batch, img_bytes, budget):
    """Largest batch tile that fits the budget, preferring an even grid length
    >= 2 so both v7x TensorCores get balanced work."""
    fits = [d for d in range(1, batch + 1) if batch % d == 0 and d * img_bytes <= budget]
    if not fits:
        return 1
    even = [d for d in fits if (batch // d) >= 2 and (batch // d) % 2 == 0]
    if even:
        return max(even)
    multi = [d for d in fits if (batch // d) >= 2]
    if multi:
        return max(multi)
    return max(fits)


def _largest_divisor(n, cap):
    """Largest divisor of n that is <= cap, preferring multiples of 8 (sublanes)."""
    cap = max(1, min(cap, n))
    divs = [d for d in range(1, cap + 1) if n % d == 0]
    mult8 = [d for d in divs if d % 8 == 0]
    return max(mult8) if mult8 else max(divs)


def spectral_attention(x, w1, b1, w2, b2, *, block_byte_budget=None):
    """x: (B, H, W, C) channels-last. Weights stored (in, out): kernel computes
    y @ W + b (equivalent to torch Linear with weight.T)."""
    B, H, W, C = x.shape
    hidden = w1.shape[1]

    budget, vmem_limit = _budgets()
    if block_byte_budget is not None:
        budget = block_byte_budget

    # Layout selection (lane-dense output is the biggest single lever).
    if C % 128 == 0:
        Hd, WC, w_dim = H * W, C, 1          # pure sublane reduce, no folds
    else:
        Hd, WC, w_dim = H, W * C, W          # wide lane dim, log2 folds
    # TODO(synk): when neither C nor W*C is a multiple of 128, pad the channel dim
    # so the elementwise pass uses unmasked full-lane stores (currently masked).

    x2 = x.reshape(B, Hd, WC)                # free contiguous reshape
    itemsize = x.dtype.itemsize
    img_bytes = Hd * WC * itemsize

    if img_bytes <= budget:
        # ---------------- fused single-pass path ----------------
        bt = _pick_bt(B, img_bytes, budget)
        out2 = pl.pallas_call(
            _fused_kernel,
            out_shape=jax.ShapeDtypeStruct((B, Hd, WC), x.dtype),
            grid=(B // bt,),
            in_specs=[
                pl.BlockSpec((bt, Hd, WC), lambda i: (i, 0, 0)),   # x (lane-dense)
                pl.BlockSpec((C, hidden), lambda i: (0, 0)),       # w1 (constant)
                pl.BlockSpec((1, hidden), lambda i: (0, 0)),       # b1
                pl.BlockSpec((hidden, C), lambda i: (0, 0)),       # w2
                pl.BlockSpec((1, C), lambda i: (0, 0)),            # b2
            ],
            out_specs=pl.BlockSpec((bt, Hd, WC), lambda i: (i, 0, 0)),
            compiler_params=pltpu.CompilerParams(
                dimension_semantics=("parallel",),
                vmem_limit_bytes=vmem_limit),
        )(x2, w1, b1, w2, b2)
    else:
        # ---------------- two-phase path (large images) ----------------
        th = _largest_divisor(Hd, max(1, budget // (WC * itemsize)))

        gate_kernel = functools.partial(_gate_pass_kernel, inv_n=1.0 / float(H * W))
        gates = pl.pallas_call(
            gate_kernel,
            out_shape=jax.ShapeDtypeStruct((B, C), jnp.float32),
            grid=(B, Hd // th),                                    # reduction axis last
            in_specs=[
                pl.BlockSpec((1, th, WC), lambda b, h: (b, h, 0)),
                pl.BlockSpec((C, hidden), lambda b, h: (0, 0)),
                pl.BlockSpec((1, hidden), lambda b, h: (0, 0)),
                pl.BlockSpec((hidden, C), lambda b, h: (0, 0)),
                pl.BlockSpec((1, C), lambda b, h: (0, 0)),
            ],
            out_specs=pl.BlockSpec((1, C), lambda b, h: (b, 0)),   # resident accumulator
            scratch_shapes=[pltpu.VMEM((1, WC), jnp.float32)],
            compiler_params=pltpu.CompilerParams(
                dimension_semantics=("parallel", "arbitrary"),
                vmem_limit_bytes=vmem_limit),
        )(x2, w1, b1, w2, b2)

        out2 = pl.pallas_call(
            _apply_pass_kernel,
            out_shape=jax.ShapeDtypeStruct((B, Hd, WC), x.dtype),
            grid=(B, Hd // th),
            in_specs=[
                pl.BlockSpec((1, C), lambda b, h: (b, 0)),
                pl.BlockSpec((1, th, WC), lambda b, h: (b, h, 0)),
            ],
            out_specs=pl.BlockSpec((1, th, WC), lambda b, h: (b, h, 0)),
            compiler_params=pltpu.CompilerParams(
                dimension_semantics=("parallel", "parallel"),
                vmem_limit_bytes=vmem_limit),
        )(gates, x2)

    return out2.reshape(B, H, W, C)


# --------------------------------------------------------------------------- #
# Reference + test
# --------------------------------------------------------------------------- #
def _reference(x, w1, b1, w2, b2):
    """Pure-JAX reference mirroring the PyTorch forward."""
    xf = x.astype(jnp.float32)
    y = jnp.mean(xf, axis=(1, 2))                          # (B, C)
    h = jnp.maximum(y @ w1 + b1, 0.0)
    s = jax.nn.sigmoid(h @ w2 + b2)                        # (B, C)
    return (xf * s[:, None, None, :]).astype(x.dtype)


if __name__ == "__main__":
    # in_channels must be >= 16 so that in_channels // 16 >= 1.
    B, H, W, C = 2, 8, 8, 32
    hidden = C // 16  # = 2

    key = jax.random.PRNGKey(0)
    kx, k1, k2, k3, k4 = jax.random.split(key, 5)

    x = jax.random.normal(kx, (B, H, W, C), dtype=jnp.float32)

    # Deterministic parameter init (PyTorch-style uniform(-1/sqrt(fan_in), ...)).
    bound1 = 1.0 / float(C ** 0.5)
    w1 = jax.random.uniform(k1, (C, hidden), jnp.float32, -bound1, bound1)
    b1 = jax.random.uniform(k2, (1, hidden), jnp.float32, -bound1, bound1)
    bound2 = 1.0 / float(hidden ** 0.5)
    w2 = jax.random.uniform(k3, (hidden, C), jnp.float32, -bound2, bound2)
    b2 = jax.random.uniform(k4, (1, C), jnp.float32, -bound2, bound2)

    ref = _reference(x, w1, b1, w2, b2)

    # Fused single-pass path (default budgets).
    out = spectral_attention(x, w1, b1, w2, b2)
    out = jax.block_until_ready(out)
    assert out.shape == x.shape and out.dtype == x.dtype
    assert jnp.allclose(out, ref, atol=1e-5, rtol=1e-5), "fused path mismatch vs reference"

    # Two-phase (large-image) path, exercised by forcing a tiny block budget.
    out2p = spectral_attention(x, w1, b1, w2, b2, block_byte_budget=4096)
    out2p = jax.block_until_ready(out2p)
    assert jnp.allclose(out2p, ref, atol=1e-5, rtol=1e-5), "two-phase path mismatch vs reference"

    print("KERNEL_OK")
</pallas_src>

<mosaic_0001>
module attributes {stable_mosaic.version = 11 : i64} {
  func.func @_fused_kernel(%arg0: i32, %arg1: memref<1x8x256xf32, #tpu.memory_space<vmem>>, %arg2: memref<32x2xf32, #tpu.memory_space<vmem>>, %arg3: memref<1x2xf32, #tpu.memory_space<vmem>>, %arg4: memref<2x32xf32, #tpu.memory_space<vmem>>, %arg5: memref<1x32xf32, #tpu.memory_space<vmem>>, %arg6: memref<1x8x256xf32, #tpu.memory_space<vmem>>) attributes {dimension_semantics = [#tpu.dimension_semantics<parallel>], iteration_bounds = array<i64: 2>, scalar_prefetch = 0 : i64, scratch_operands = 0 : i64, tpu.core_type = #tpu.core_type<tc>, window_params = [{transform_indices = @transform_0, window_bounds = array<i64: 1, 8, 256>}, {pipeline_mode = #tpu.pipeline_mode<synchronous>, transform_indices = @transform_1, window_bounds = array<i64: 32, 2>}, {pipeline_mode = #tpu.pipeline_mode<synchronous>, transform_indices = @transform_2, window_bounds = array<i64: 1, 2>}, {pipeline_mode = #tpu.pipeline_mode<synchronous>, transform_indices = @transform_3, window_bounds = array<i64: 2, 32>}, {pipeline_mode = #tpu.pipeline_mode<synchronous>, transform_indices = @transform_4, window_bounds = array<i64: 1, 32>}, {transform_indices = @transform_5, window_bounds = array<i64: 1, 8, 256>}]} {
    %c0 = arith.constant 0 : index
    %c0_0 = arith.constant 0 : index
    %c0_1 = arith.constant 0 : index
    %0 = vector.load %arg1[%c0, %c0_0, %c0_1] : memref<1x8x256xf32, #tpu.memory_space<vmem>>, vector<1x8x256xf32>
    %cst = arith.constant dense<0.000000e+00> : vector<1x256xf32>
    %1 = vector.multi_reduction <add>, %0, %cst [1] : vector<1x8x256xf32> to vector<1x256xf32>
    %2 = vector.extract_strided_slice %1 {offsets = [0, 0], sizes = [1, 128], strides = [1, 1]} : vector<1x256xf32> to vector<1x128xf32>
    %3 = vector.extract_strided_slice %1 {offsets = [0, 128], sizes = [1, 128], strides = [1, 1]} : vector<1x256xf32> to vector<1x128xf32>
    %4 = arith.addf %2, %3 : vector<1x128xf32>
    %5 = vector.extract_strided_slice %4 {offsets = [0, 0], sizes = [1, 64], strides = [1, 1]} : vector<1x128xf32> to vector<1x64xf32>
    %6 = vector.extract_strided_slice %4 {offsets = [0, 64], sizes = [1, 64], strides = [1, 1]} : vector<1x128xf32> to vector<1x64xf32>
    %7 = arith.addf %5, %6 : vector<1x64xf32>
    %8 = vector.extract_strided_slice %7 {offsets = [0, 0], sizes = [1, 32], strides = [1, 1]} : vector<1x64xf32> to vector<1x32xf32>
    %9 = vector.extract_strided_slice %7 {offsets = [0, 32], sizes = [1, 32], strides = [1, 1]} : vector<1x64xf32> to vector<1x32xf32>
    %10 = arith.addf %8, %9 : vector<1x32xf32>
    %cst_2 = arith.constant 1.562500e-02 : f32
    %11 = vector.broadcast %cst_2 : f32 to vector<1x32xf32>
    %12 = arith.mulf %10, %11 : vector<1x32xf32>
    %c0_3 = arith.constant 0 : index
    %c0_4 = arith.constant 0 : index
    %13 = vector.load %arg2[%c0_3, %c0_4] : memref<32x2xf32, #tpu.memory_space<vmem>>, vector<32x2xf32>
    %cst_5 = arith.constant dense<0.000000e+00> : vector<1x2xf32>
    %14 = tpu.matmul %12, %13, %cst_5 {dimension_numbers = #tpu.dot_dimension_numbers<[1], [0], [0], [1], [0, 0, 1, 1], [], []>} : vector<1x32xf32>, vector<32x2xf32>, vector<1x2xf32> -> vector<1x2xf32>
    %c0_6 = arith.constant 0 : index
    %c0_7 = arith.constant 0 : index
    %15 = vector.load %arg3[%c0_6, %c0_7] : memref<1x2xf32, #tpu.memory_space<vmem>>, vector<1x2xf32>
    %16 = arith.addf %14, %15 : vector<1x2xf32>
    %cst_8 = arith.constant 0.000000e+00 : f32
    %17 = vector.broadcast %cst_8 : f32 to vector<1x2xf32>
    %18 = arith.maximumf %16, %17 : vector<1x2xf32>
    %c0_9 = arith.constant 0 : index
    %c0_10 = arith.constant 0 : index
    %19 = vector.load %arg4[%c0_9, %c0_10] : memref<2x32xf32, #tpu.memory_space<vmem>>, vector<2x32xf32>
    %cst_11 = arith.constant dense<0.000000e+00> : vector<1x32xf32>
    %20 = tpu.matmul %18, %19, %cst_11 {dimension_numbers = #tpu.dot_dimension_numbers<[1], [0], [0], [1], [0, 0, 1, 1], [], []>} : vector<1x2xf32>, vector<2x32xf32>, vector<1x32xf32> -> vector<1x32xf32>
    %c0_12 = arith.constant 0 : index
    %c0_13 = arith.constant 0 : index
    %21 = vector.load %arg5[%c0_12, %c0_13] : memref<1x32xf32, #tpu.memory_space<vmem>>, vector<1x32xf32>
    %22 = arith.addf %20, %21 : vector<1x32xf32>
    %23 = arith.negf %22 : vector<1x32xf32>
    %24 = math.exp %23 : vector<1x32xf32>
    %cst_14 = arith.constant 1.000000e+00 : f32
    %25 = vector.broadcast %cst_14 : f32 to vector<1x32xf32>
    %26 = arith.addf %25, %24 : vector<1x32xf32>
    %27 = arith.divf %25, %26 : vector<1x32xf32>
    %28 = tpu.concatenate %27, %27 in 1 : vector<1x32xf32>, vector<1x32xf32> -> vector<1x64xf32>
    %29 = tpu.concatenate %28, %28 in 1 : vector<1x64xf32>, vector<1x64xf32> -> vector<1x128xf32>
    %30 = tpu.concatenate %29, %29 in 1 : vector<1x128xf32>, vector<1x128xf32> -> vector<1x256xf32>
    %c0_15 = arith.constant 0 : index
    %c0_16 = arith.constant 0 : index
    %c0_17 = arith.constant 0 : index
    %31 = vector.load %arg1[%c0_15, %c0_16, %c0_17] : memref<1x8x256xf32, #tpu.memory_space<vmem>>, vector<1x8x256xf32>
    %32 = vector.shape_cast %30 : vector<1x256xf32> to vector<1x1x256xf32>
    %33 = vector.broadcast %32 : vector<1x1x256xf32> to vector<1x8x256xf32>
    %34 = arith.mulf %31, %33 : vector<1x8x256xf32>
    %c0_18 = arith.constant 0 : index
    %c0_19 = arith.constant 0 : index
    %c0_20 = arith.constant 0 : index
    %35 = vector.load %arg6[%c0_18, %c0_19, %c0_20] : memref<1x8x256xf32, #tpu.memory_space<vmem>>, vector<1x8x256xf32>
    tpu.vector_store %arg6[%c0_18, %c0_19, %c0_20], %34 {strides = array<i32>} : memref<1x8x256xf32, #tpu.memory_space<vmem>>, vector<1x8x256xf32>,
    return
  }
  func.func @transform_0(%arg0: i32) -> (i32, i32, i32) {
    %c0_i32 = arith.constant 0 : i32
    %c0_i32_0 = arith.constant 0 : i32
    %c0_i32_1 = arith.constant 0 : i32
    return %arg0, %c0_i32, %c0_i32_0 : i32, i32, i32
  }
  func.func @transform_1(%arg0: i32) -> (i32, i32) {
    %c0_i32 = arith.constant 0 : i32
    %c0_i32_0 = arith.constant 0 : i32
    %c0_i32_1 = arith.constant 0 : i32
    return %c0_i32, %c0_i32_0 : i32, i32
  }
  func.func @transform_2(%arg0: i32) -> (i32, i32) {
    %c0_i32 = arith.constant 0 : i32
    %c0_i32_0 = arith.constant 0 : i32
    %c0_i32_1 = arith.constant 0 : i32
    return %c0_i32, %c0_i32_0 : i32, i32
  }
  func.func @transform_3(%arg0: i32) -> (i32, i32) {
    %c0_i32 = arith.constant 0 : i32
    %c0_i32_0 = arith.constant 0 : i32
    %c0_i32_1 = arith.constant 0 : i32
    return %c0_i32, %c0_i32_0 : i32, i32
  }
  func.func @transform_4(%arg0: i32) -> (i32, i32) {
    %c0_i32 = arith.constant 0 : i32
    %c0_i32_0 = arith.constant 0 : i32
    %c0_i32_1 = arith.constant 0 : i32
    return %c0_i32, %c0_i32_0 : i32, i32
  }
  func.func @transform_5(%arg0: i32) -> (i32, i32, i32) {
    %c0_i32 = arith.constant 0 : i32
    %c0_i32_0 = arith.constant 0 : i32
    %c0_i32_1 = arith.constant 0 : i32
    return %arg0, %c0_i32, %c0_i32_0 : i32, i32, i32
  }
}

</mosaic_0001>

<bundles_post_ra>
// kernel: tpu_custom_call.1
= control target key start
LH: loop header
LB: loop body
LE: loop exit
PB: predicated region body
PF: predicated region fallthrough
CT: control target
= control target key end

     0   :  { %10 = vsyncpa [#allocation3], 0  ;;  %s1344_s0 = inlined_call_operand.hbm [shape: f32[2,8,256], index: 0, kind: input, shape index: {}]   ;;  %s1345_s1 = inlined_call_operand.hbm [shape: f32[32,2], index: 1, kind: input, shape index: {}]   ;;  %s1346_s2 = inlined_call_operand.hbm [shape: f32[1,2], index: 2, kind: input, shape index: {}]   ;;  %s1347_s3 = inlined_call_operand.hbm [shape: f32[2,32], index: 3, kind: input, shape index: {}]   ;;  %s1348_s4 = inlined_call_operand.hbm [shape: f32[1,32], index: 4, kind: input, shape index: {}]   ;;  %s1349_s5 = inlined_call_operand.hbm [shape: f32[2,8,256], index: 5, kind: output, shape index: {}]  }
   0x1   :  { %12 = vsyncpa [#allocation3 + $0x1], 0 }
   0x2   :  { %13 = vsyncpa [#allocation6], 0 }
   0x3   :  { %14 = vsyncpa [#allocation9], 0 }
   0x4   :  { %15 = vsyncpa [#allocation4], 0 }
   0x5   :  { %17 = vsyncpa [#allocation4 + $0x1], 0  ;;  %s1045_s18 = smov 0   ;;  %s1047_s19 = smov 0  }
   0x6   :  { %s1049_s20 = smov 0   ;;  %s1051_s21 = smov 0  }
   0x7 LB: > { %s1001_s22 = smov [#allocation5]   ;;  %s1066_s24 = sadd.s32 4294967295, %s999_s21   ;;  %s999_s21 = sphi %s1051_s21, %s1373_s21   ;;  %s995_s20 = sphi %s1049_s20, %s1372_s20   ;;  %s991_s19 = sphi %s1047_s19, %s1371_s19   ;;  %s987_s18 = sphi %s1045_s18, %s1370_s18  }
   0x8   : > { %s176_s23 = sshll.u32 %s1001_s22, 4  ;;  %p628_p0 = scmp.ge.s32.totalorder %s999_s21, 1  ;;  %s1071_s23 = int_to_ptr.vmem [resolvable:$true] %s176_s23 }
   0x9   : > { %p1350_p1 = scmp.eq.s32.totalorder %s1066_s24, 0  ;;  %p164_p2 = scmp.lt.s32.totalorder %s999_s21, 3 }
   0xa   : > { %s1002_s26 = smov [#allocation8]   ;;  %s1003_s29 = smov [#allocation7]  }
   0xb   : > { %p1073_p3 = pnand %p628_p0, %p164_p2  ;;  %s201_s27 = sshll.u32 %s1002_s26, 4  ;;  %s1086_s27 = int_to_ptr.vmem [resolvable:$true] %s201_s27 }
   0xc   : > { %s190_s30 = sshll.u32 %s1003_s29, 4  ;;  %s783_s8 = scalar_lea.hbm %s1345_s1, 512  ;;  %s1088_s30 = int_to_ptr.vmem [resolvable:$true] %s190_s30 }
   0xd   : > { %s1353_s25 = scalar_select %p1073_p3, 1, 0 }
   0xe   : > { %p704_p5 = pneg %p1073_p3  ;;  %p784_p7 = scmp.ne.s32.totalorder %s1345_s1, %s783_s8 }
   0xf   : > { %p790_p11 = scmp.lt.u32.totalorder %s783_s8, %s1345_s1 }
  0x10   : > { %p1082_p6 = pnand %p704_p5, %p1350_p1 }
  0x12   : > { %p1098_p8 = pneg %p1082_p6 }
  0x14   : > { %p786_p9 = pnand %p1098_p8, %p784_p7 }
  0x16   : > { %p787_p10 = pneg %p786_p9 }
  0x18   : > { %p792_p12 = pnand %p790_p11, %p787_p10 }
  0x1a   : > { %795 = shalt.err (!%p792_p12)
}
  0x1b   : > { %s796_s14 = scalar_lea.vmem %s1071_s23, 512  ;;  %p804_p5 = scmp.lt.s32.totalorder %s1071_s23, %s1071_s23 }
  0x1c   : > { %p797_p13 = scmp.ne.s32.totalorder %s1071_s23, %s796_s14  ;;  %p805_p4 = scmp.lt.s32.totalorder %s796_s14, %s796_s14 }
  0x1e   : > { %p799_p0 = pnand %p797_p13, %p1098_p8  ;;  %p806_p7 = por %p805_p4, %p804_p5 }
  0x20   : > { %p800_p2 = pneg %p799_p0 }
  0x22   : > { %p807_p9 = pnand %p806_p7, %p800_p2 }
  0x24   : > { %810 = shalt.err (!%p807_p9)
}
  0x25   : > { %s1004_s15 = smov 128   ;;  %s1005_s16 = smov 8  }
  0x26   : > { %707 = dma.hbm_to_vmem [thread:$0]  (!%p1082_p6), %s1345_s1, 512, %s1071_s23, [#allocation6], %s1004_s15, %s1004_s15, %s1005_s16  }
  0x27   : > { %s811_s6 = scalar_lea.hbm %s1347_s3, 32 }
  0x28   : > { %p812_p4 = scmp.ne.s32.totalorder %s1347_s3, %s811_s6  ;;  %p818_p12 = scmp.lt.u32.totalorder %s811_s6, %s1347_s3 }
  0x2a   : > { %p814_p10 = pnand %p812_p4, %p1098_p8 }
  0x2c   : > { %p815_p11 = pneg %p814_p10 }
  0x2e   : > { %p820_p13 = pnand %p818_p12, %p815_p11 }
  0x30   : > { %823 = shalt.err (!%p820_p13)
}
  0x31   : > { %s824_s23 = scalar_lea.vmem %s1086_s27, 32  ;;  %p832_p7 = scmp.lt.s32.totalorder %s1086_s27, %s1086_s27 }
  0x32   : > { %p825_p0 = scmp.ne.s32.totalorder %s1086_s27, %s824_s23  ;;  %p833_p9 = scmp.lt.s32.totalorder %s824_s23, %s824_s23 }
  0x34   : > { %p827_p2 = pnand %p825_p0, %p1098_p8  ;;  %p834_p4 = por %p833_p9, %p832_p7 }
  0x36   : > { %p828_p5 = pneg %p827_p2 }
  0x38   : > { %p835_p10 = pnand %p834_p4, %p828_p5 }
  0x3a   : > { %838 = shalt.err (!%p835_p10)
}
  0x3b   : > { %713 = dma.hbm_to_vmem [thread:$0]  (!%p1082_p6), %s1347_s3, 32, %s1086_s27, [#allocation9]  }
  0x3c   : > { %s839_s16 = scalar_lea.hbm %s1346_s2, 16 }
  0x3d   : > { %p840_p11 = scmp.ne.s32.totalorder %s1346_s2, %s839_s16  ;;  %p846_p0 = scmp.lt.u32.totalorder %s839_s16, %s1346_s2 }
  0x3f   : > { %p842_p12 = pnand %p840_p11, %p1098_p8 }
  0x41   : > { %p843_p13 = pneg %p842_p12 }
  0x43   : > { %p848_p2 = pnand %p846_p0, %p843_p13 }
  0x45   : > { %851 = shalt.err (!%p848_p2)
}
  0x46   : > { %s852_s27 = scalar_lea.vmem %s1088_s30, 16  ;;  %s859_s6 = scalar_lea.vmem %s1088_s30, 32 }
  0x47   : > { %p853_p5 = scmp.ne.s32.totalorder %s1088_s30, %s852_s27  ;;  %p860_p4 = scmp.lt.s32.totalorder %s1088_s30, %s1088_s30 }
  0x48   : > { %p861_p10 = scmp.lt.s32.totalorder %s859_s6, %s852_s27 }
  0x49   : > { %p855_p7 = pnand %p853_p5, %p1098_p8 }
  0x4a   : > { %p862_p11 = por %p861_p10, %p860_p4 }
  0x4b   : > { %p856_p9 = pneg %p855_p7 }
  0x4d   : > { %p863_p12 = pnand %p862_p11, %p856_p9 }
  0x4f   : > { %866 = shalt.err (!%p863_p12)
}
  0x50   : > { %710 = dma.hbm_to_vmem [thread:$0]  (!%p1082_p6), %s1346_s2, 16, %s1088_s30, [#allocation6]  }
  0x51   : > { %s1006_s9 = smov [#allocation10]   ;;  %s867_s13 = scalar_lea.hbm %s1348_s4, 16 }
  0x52   : > { %s212_s10 = sshll.u32 %s1006_s9, 4  ;;  %p868_p13 = scmp.ne.s32.totalorder %s1348_s4, %s867_s13  ;;  %s213_s10 = int_to_ptr.vmem [resolvable:$true] %s212_s10 }
  0x53   : > { %p874_p5 = scmp.lt.u32.totalorder %s867_s13, %s1348_s4 }
  0x54   : > { %p870_p0 = pnand %p868_p13, %p1098_p8 }
  0x56   : > { %p871_p2 = pneg %p870_p0 }
  0x58   : > { %p876_p7 = pnand %p874_p5, %p871_p2 }
  0x5a   : > { %879 = shalt.err (!%p876_p7)
}
  0x5b   : > { %s880_s30 = scalar_lea.vmem %s213_s10, 16  ;;  %s887_s22 = scalar_lea.vmem %s213_s10, 32 }
  0x5c   : > { %p881_p9 = scmp.ne.s32.totalorder %s213_s10, %s880_s30  ;;  %p888_p11 = scmp.lt.s32.totalorder %s213_s10, %s213_s10 }
  0x5d   : > { %p889_p12 = scmp.lt.s32.totalorder %s887_s22, %s880_s30 }
  0x5e   : > { %p883_p4 = pnand %p881_p9, %p1098_p8 }
  0x5f   : > { %p890_p1 = por %p889_p12, %p888_p11 }
  0x60   : > { %p884_p10 = pneg %p883_p4 }
  0x62   : > { %p891_p3 = pnand %p890_p1, %p884_p10 }
  0x64   : > { %894 = shalt.err (!%p891_p3)
}
  0x65   : > { %716 = dma.hbm_to_vmem [thread:$0]  (!%p1082_p6), %s1348_s4, 16, %s213_s10, [#allocation9]  }
  0x66   : > { %s627_s11 = sadd.s32 4294967294, %s999_s21   ;;  %s1186_s28 = sadd.s32 1, %s999_s21  }
  0x67   : > { %s27_s27 = ssub.s32 %s999_s21, %s1186_s28  ;;  %s30_s6 = sadd.s32 1, %s995_s20 }
  0x68   : > { %p28_p1 = scmp.eq.s32.totalorder %s27_s27, 0  ;;  %p37_p3 = scmp.ne.s32.totalorder %s995_s20, %s991_s19 }
  0x69   : > { %p38_p8 = scmp.eq.s32.totalorder %s999_s21, 0  ;;  %p43_p13 = scmp.ne.s32.totalorder %s991_s19, %s987_s18 }
  0x6a   : > { %s1197_s7 = scalar_select %p28_p1, %s995_s20, %s30_s6  }
  0x6b   : > { %p1199_p0 = por %p38_p8, %p37_p3  ;;  %p1357_p2 = scmp.eq.s32.totalorder %s1066_s24, 0 }
  0x6c   : > { %p151_p5 = scmp.eq.s32.totalorder %s1066_s24, 1  ;;  %p157_p7 = scmp.eq.s32.totalorder %s627_s11, 1 }
  0x6d   : > { %p1205_p6 = por %p1357_p2, %p43_p13  ;;  %p729_p9 = scmp.lt.s32.totalorder %s999_s21, 2 }
  0x6e   : > { %s223_s10 = sand.u32 1, %s995_s20   ;;  %p1212_p4 = por %p151_p5, %p37_p3 }
  0x6f   : > { %p1216_p10 = por %p157_p7, %p43_p13  ;;  %s634_s13 = sshll.u32 %s223_s10, 4 }
  0x70   : > { %s1359_s23 = scalar_select %p1212_p4, 1, 0 }
  0x71   : > { %s1360_s12 = scalar_select %p1216_p10, 1, 0 }
  0x72   : > { %s653_s14 = sshll.u32 %s999_s21, 8  ;;  %s227_s30 = scalar_lea.vmem [#allocation2], %s634_s13 }
  0x73   : > { %s1224_s17 = scalar_lea.hbm %s1344_s0, %s653_s14  ;;  %s235_s22 = sshll.u32 %s227_s30, 4  ;;  %s1226_s22 = int_to_ptr.vmem [resolvable:$true] %s235_s22 }
  0x74   : > { %p1230_p11 = pnand %p729_p9, %p1199_p0  ;;  %s224_s29 = scalar_lea.sflag [#allocation3], %s223_s10 }
  0x75   : > { %s895_s11 = scalar_lea.hbm %s1224_s17, 256  ;;  %s900_s13 = scalar_lea.hbm %s1344_s0, 512 }
  0x76   : > { %p896_p12 = scmp.ne.s32.totalorder %s1224_s17, %s895_s11  ;;  %p897_p1 = pneg %p1230_p11 }
  0x77   : > { %p901_p13 = scmp.lt.u32.totalorder %s1224_s17, %s1344_s0  ;;  %p902_p0 = scmp.lt.u32.totalorder %s900_s13, %s895_s11 }
  0x78   : > { %p898_p3 = pnand %p897_p1, %p896_p12  ;;  %p904_p5 = scmp.lt.u32.totalorder %s895_s11, %s1224_s17 }
  0x79   : > { %p903_p2 = por %p902_p0, %p901_p13 }
  0x7a   : > { %p899_p8 = pneg %p898_p3 }
  0x7b   : > { %p905_p7 = por %p904_p5, %p903_p2 }
  0x7d   : > { %p906_p9 = pnand %p905_p7, %p899_p8 }
  0x7f   : > { %909 = shalt.err (!%p906_p9)
}
  0x80   : > { %s910_s10 = scalar_lea.vmem %s1226_s22, 256  ;;  %s1007_s15 = smov [#allocation2]  }
  0x81   : > { %p911_p12 = scmp.ne.s32.totalorder %s1226_s22, %s910_s10  ;;  %s915_s16 = sshll.u32 %s1007_s15, 4  ;;  %s916_s16 = int_to_ptr.vmem [resolvable:$false] %s915_s16 }
  0x82   : > { %s917_s30 = scalar_lea.vmem %s916_s16, 512  ;;  %p918_p4 = scmp.lt.s32.totalorder %s1226_s22, %s916_s16 }
  0x83   : > { %p913_p3 = pnand %p911_p12, %p897_p1  ;;  %p919_p13 = scmp.lt.s32.totalorder %s917_s30, %s910_s10 }
  0x85   : > { %p914_p10 = pneg %p913_p3  ;;  %p920_p0 = por %p919_p13, %p918_p4 }
  0x87   : > { %p921_p2 = pnand %p920_p0, %p914_p10 }
  0x89   : > { %924 = shalt.err (!%p921_p2)
}
  0x8a   : > { %720 = dma.hbm_to_vmem [thread:$0]  (!%p1230_p11), %s1224_s17, 256, %s1226_s22, %s224_s29  }
  0x8b   : > { %p1362_p8 = scmp.ne.s32.totalorder %s1353_s25, 0 }
  0x8c   : > { %s1262_s11 = sand.u32 (!%p1362_p8), 1, %s991_s19  }
  0x8d   : > { %244 = sbr.rel (%p1362_p8) target bundleno = 1112 (0x458), region = 40  ;;  %s638_s27 = sshll.u32 (!%p1362_p8), %s1262_s11, 4 }
  0x8e   : > { %s247_s6 = scalar_lea.sflag (!%p1362_p8), [#allocation3], %s1262_s11  ;;  %s250_s13 = scalar_lea.vmem (!%p1362_p8), [#allocation2], %s638_s27 }
  0x94   : > { %970 = dma.done.wait (%p1205_p6), %s247_s6, 256  }
  0x95   : > { %972 = vsyncadd (%p1205_p6), %s247_s6, 4294967040  ;;  %p1363_p4 = scmp.eq.s32.totalorder %s1066_s24, 0 }
  0x97   : > { %974 = dma.done.wait (%p1363_p4), [#allocation6], 528   ;;  %p1364_p10 = pmov %p1363_p4 }
  0x98   : > { %p1365_p11 = pmov %p1363_p4 }
  0x99   : > { %976 = vsyncadd (%p1364_p10), [#allocation6], 4294966768 }
  0x9a   : > { %978 = dma.done.wait (%p1365_p11), [#allocation9], 48   ;;  %p1366_p1 = pmov %p1363_p4 }
  0x9b   : > { %v1280_v0 = vld [vmem:[%s250_s13] sm:$0xff]  ;;  %v1282_v1 = vld [vmem:[%s250_s13 + $0x8] sm:$0xff]  ;;  %v1008_v10 = vmov 0.0|0.0   ;;  %s1009_s25 = smov 64   ;;  %vm1010_vm0 = vmmov 0   ;;  %v1011_v22 = vmov 0.0   ;;  %v496_v44 = vlaneseq }
  0x9c   : > { %980 = vsyncadd (%p1366_p1), [#allocation9], 4294967248  ;;  %v295_v2 = vrot.slane %v1280_v0, 4  ;;  %v301_v3 = vrot.slane %v1282_v1, 4  ;;  %v319_v6 = vld [vmem:[#allocation5] sm:$0xff]  ;;  %v320_v7 = vld [vmem:[#allocation5 + $0x8] sm:$0xff]  ;;  %678 = vmatprep.subr.bf16.mxu0 %v1008_v10  ;;  %670 = vmatprep.mubr.msk.f32.mxu0 %vm1010_vm0, %v1011_v22 }
  0x9d   : > { %v679_v11 = vpack.c.bf16 %v320_v7, %v319_v6  ;;  %v321_v19 = vld [vmem:[#allocation5 + $0x10] sm:$0xff]  ;;  %v322_v20 = vld [vmem:[#allocation5 + $0x18] sm:$0xff]  ;;  %673 = vmatprep.subr.mxu1 %v1011_v22  ;;  %675 = vmatprep.mubr.msk.f32.mxu1 %vm1010_vm0, %v1011_v22  ;;  %s1012_s9 = smov 96   ;;  %vm324_vm1 = vcmask 261120   ;;  %v399_v28 = vld [vmem:[#allocation8] sm:$0x3] }
  0x9e   : > { %v296_v4 = vadd.f32 %v295_v2, %v1280_v0  ;;  %v302_v5 = vadd.f32 %v301_v3, %v1282_v1  ;;  %v682_v21 = vpack.c.bf16 %v322_v20, %v321_v19  ;;  %vm405_vm2 = vcmask 1041408   ;;  %v323_v29 = vld [vmem:[#allocation7] sm:$0x1]  ;;  %v400_v34 = vld [vmem:[#allocation10] sm:$0x1]  ;;  %s1013_s17 = smov 32  }
  0x9f   : > { %680 = vmatpush3.bf16.msra.mxu0 %v679_v11  ;;  %674 = vmatpush3.msk.msra.mxu1 %vm405_vm2, %v399_v28  ;;  %vm401_vm3 = vcmask 15360   ;;  %v497_v45 = vshrl.u32 %v496_v44, 7  ;;  %vm494_vm4 = vcmask 523264   ;;  %s654_s22 = sshll.u32 %s1066_s24, 8  ;;  %s292_s26 = scalar_lea.vmem [#allocation11], %s638_s27 }
  0xa0   : > { %v297_v8 = vrot.slane %v296_v4, 2  ;;  %v303_v9 = vrot.slane %v302_v5, 2  ;;  %681 = vmatprep.subr.bf16.mxu0 %v1008_v10  ;;  %s519_s29 = sshll.u32 %s292_s26, 4  ;;  %s1300_s10 = scalar_lea.hbm %s1349_s5, %s654_s22  ;;  %s1302_s29 = int_to_ptr.vmem [resolvable:$true] %s519_s29 }
  0xa1   : > { %v498_v46 = vsub.s32 0, %v497_v45  ;;  %s505_s24 = scalar_lea.sflag [#allocation4], %s1262_s11  ;;  %s925_s15 = scalar_lea.vmem %s1302_s29, 256 }
  0xa2   : > { %v298_v12 = vadd.f32 %v297_v8, %v296_v4  ;;  %v304_v13 = vadd.f32 %v303_v9, %v302_v5  ;;  %p926_p6 = scmp.ne.s32.totalorder %s1302_s29, %s925_s15  ;;  %p1367_p5 = scmp.ne.s32.totalorder %s1359_s23, 0 }
  0xa3   : > { %683 = vmatpush3.bf16.msra.mxu0 %v682_v21  ;;  %s1014_s16 = smov [#allocation11]  }
  0xa4   : > { %v299_v14 = vrot.slane %v298_v12, 1  ;;  %v305_v15 = vrot.slane %v304_v13, 1  ;;  %p927_p7 = pnand %p926_p6, %p1367_p5  ;;  %s929_s30 = sshll.u32 %s1014_s16, 4  ;;  %s930_s30 = int_to_ptr.vmem [resolvable:$false] %s929_s30 }
  0xa5   : > { %s931_s27 = scalar_lea.vmem %s930_s30, 512  ;;  %p932_p12 = scmp.lt.s32.totalorder %s1302_s29, %s930_s30 }
  0xa6   : > { %v300_v16 = vadd.f32 %v299_v14, %v298_v12  ;;  %v306_v17 = vadd.f32 %v305_v15, %v304_v13  ;;  %p928_p9 = pneg %p927_p7  ;;  %p933_p3 = scmp.lt.s32.totalorder %s931_s27, %s925_s15 }
  0xa8   : > { %v307_v18 = vadd.f32 %v306_v17, %v300_v16  ;;  %p934_p13 = por %p933_p3, %p932_p12 }
  0xaa   : > { %309 = vrot.lane.b32.xlu0 %v307_v18, %s1009_s25  ;;  %p935_p0 = pnand %p934_p13, %p928_p9 }
 0x11c   : > { %v310_v23 = vpop.permute.xlu0 %309 }
 0x11d   : > { %v312_v24 = vadd.f32 %v310_v23, %v307_v18 }
 0x11f   : > { %314 = vrot.lane.b32.xlu0 %v312_v24, %s1012_s9 }
 0x191   : > { %v315_v25 = vpop.permute.xlu0 %314 }
 0x192   : > { %v317_v26 = vadd.f32 %v315_v25, %v312_v24 }
 0x194   : > { %v318_v27 = vmul.f32 0.015625, %v317_v26 }
 0x196   : > { %671 = vmatmul.mubr.msk.f32.vlgmr.msra.gmra.mrb[0].mxu0 %vm324_vm1, %v318_v27 }
 0x269   : > { %v394_v30 = vpop.f32.mrb[0].mxu0 }
 0x26a   : > { %v395_v31 = vadd.f32 %v394_v30, %v323_v29  ;;  %v672_v32 = vpop.f32.mrb[1].mxu0 }
 0x26c   : > { %v398_v33 = vmax.f32 %v395_v31, 0.0 }
 0x26e   : > { %676 = vmatmul.mubr.msk.f32.vlgmr.msra.gmra.mrb[0].mxu1 %vm401_vm3, %v398_v33 }
 0x341   : > { %v475_v35 = vpop.f32.mrb[0].mxu1 }
 0x342   : > { %v476_v36 = vadd.f32 %v475_v35, %v400_v34  ;;  %v677_v37 = vpop.f32.mrb[1].mxu1 }
 0x344   : > { %v647_v38 = vmul.f32 -1.442695, %v476_v36 }
 0x346   : > { %779 = vpow2.f32 %v647_v38 }
 0x350   : > { %v780_v39 = vpop.eup %779 }
 0x351   : > { %v482_v40 = vadd.f32 1.0, %v780_v39 }
 0x353   : > { %781 = vrcp.f32 %v482_v40 }
 0x35d   : > { %v782_v41 = vpop.eup %781 }
 0x35e   : > { %486 = vrot.lane.b32.xlu1 %v782_v41, %s1013_s17 }
 0x3d0   : > { %v487_v42 = vpop.permute.xlu1 %486 }
 0x3d1   : > { %v489_v43 = vsel %vm324_vm1, %v782_v41, %v487_v42 }
 0x3d2   : > { %491 = vrot.lane.b32.xlu1 %v489_v43, %s1009_s25 }
 0x444   : > { %v492_v47 = vpop.permute.xlu1 %491 }
 0x445   : > { %v495_v48 = vsel %vm494_vm4, %v489_v43, %v492_v47 }
 0x446   : > { %v499_v49 = vrot.slane %v495_v48, %v498_v46 }
 0x448   : > { %v500_v50 = vmul.f32 %v499_v49, %v1280_v0  ;;  %v501_v51 = vmul.f32 %v499_v49, %v1282_v1 }
 0x44a   : > { %502 = vst [vmem:[%s292_s26] sm:$0xff] %v500_v50  ;;  %503 = vst [vmem:[%s292_s26 + $0x8] sm:$0xff] %v501_v51 }
 0x44b   : > { %938 = shalt.err (!%p935_p0)
}
 0x44c   : > { %s939_s11 = scalar_lea.hbm %s1300_s10, 256  ;;  %s943_s25 = scalar_lea.hbm %s1349_s5, 512 }
 0x44d   : > { %p940_p2 = scmp.ne.s32.totalorder %s1300_s10, %s939_s11  ;;  %p944_p10 = scmp.lt.u32.totalorder %s1300_s10, %s1349_s5 }
 0x44e   : > { %p945_p11 = scmp.lt.u32.totalorder %s943_s25, %s939_s11  ;;  %p947_p6 = scmp.lt.u32.totalorder %s939_s11, %s1300_s10 }
 0x44f   : > { %p941_p8 = pnand %p940_p2, %p1367_p5 }
 0x450   : > { %p946_p1 = por %p945_p11, %p944_p10 }
 0x451   : > { %p942_p4 = pneg %p941_p8 }
 0x452   : > { %p948_p7 = por %p947_p6, %p946_p1 }
 0x454   : > { %p949_p9 = pnand %p948_p7, %p942_p4 }
 0x456   : > { %952 = shalt.err (!%p949_p9)
}
 0x457   : > { %702 = dma.vmem_to_hbm [thread:$0]  (%p1367_p5), %s1302_s29, 256, %s1300_s10, %s505_s24  }
 0x458 PF: > { %s531_s22 = sand.u32 1, %s987_s18   ;;  %p1368_p12 = scmp.ne.s32.totalorder %s1360_s12, 0 }
 0x459   : > { %p1369_p3 = scmp.ge.s32.totalorder %s999_s21, 2  ;;  %s532_s26 = scalar_lea.sflag [#allocation4], %s531_s22 }
 0x45b   : > { %p722_p13 = pnand %p1369_p3, %p1368_p12 }
 0x45d   : > { %982 = dma.done.wait (!%p722_p13), %s532_s26, 256  }
 0x45e   : > { %984 = vsyncadd (!%p722_p13), %s532_s26, 4294967040  ;;  %p20_p0 = scmp.ge.s32.totalorder %s1186_s28, 4   ;;  %s1370_s18 = smov %s991_s19 }
 0x45f   : > { %s1371_s19 = smov %s995_s20  ;;  %s1372_s20 = smov %s1197_s7 }
 0x460   : > { %s1373_s21 = smov %s1186_s28  ;;  %22 = sbr.rel (!%p20_p0) target bundleno = 7 (0x7), region = 101 }
 0x467   :  { %537 = vsyncpa [#allocation3], 1 }
 0x468   :  { %539 = vsyncpa [#allocation3 + $0x1], 1 }
 0x469   :  { %540 = vsyncpa [#allocation6], 1 }
 0x46a   :  { %541 = vsyncpa [#allocation9], 1 }
 0x46b   :  { %542 = vsyncpa [#allocation4], 1 }
 0x46c   :  { %544 = vsyncpa [#allocation4 + $0x1], 1 }

</bundles_post_ra>
